<compile_context>
chip_gen: v7x
topology: tpu7x:2x2x1
jax: 0.10.0
libtpu: 0.0.40
codegen_flags: <defaults>
</compile_context>

<pallas_src>
import math
import functools

import jax
import jax.numpy as jnp
from jax.experimental import pallas as pl
from jax.experimental.pallas import tpu as pltpu


def _mha_kernel(t_ref, m_ref,
                wq_ref, bq_ref,     # (E, E)  = Wq * scale          ; (E, 1)  = bq * scale
                wkv_ref, bkv_ref,   # (2E, E) = concat[Wk; Wv]      ; (2E, 1) = concat[bk; bv]
                wo_ref, bo_ref,     # (E, E)  = Wo                  ; (E, 1)  = bo
                out_ref,
                *, n_heads: int):
    """One batch element of multi-head cross attention (q=temporal, k=v=meta)."""
    _, Lq, E = t_ref.shape
    Lk = m_ref.shape[2]
    H = n_heads
    Dh = E // H

    t = t_ref[0]                    # (Lq, E)
    m = m_ref[0]                    # (E, Lk)  -- native meta layout, no wrapper transpose

    # ---- Q projection in feature-major space ------------------------------
    # qT = (Wq*scale) @ t.T + (bq*scale)[:, None]      -> (E, Lq)
    qT = jnp.dot(wq_ref[...], t.T, preferred_element_type=jnp.float32) + bq_ref[...]
    # Head split: leading-dim reshape (sublane-tile aligned, free) + one small
    # batched minor-dims transpose -> (H, Lq, Dh).
    q3 = jnp.swapaxes(qT.reshape(H, Dh, Lq), 1, 2)

    # ---- fused K/V projection straight from the native (E, Lk) layout -----
    # kvT = [Wk; Wv] @ m + [bk; bv][:, None]           -> (2E, Lk)
    kvT = jnp.dot(wkv_ref[...], m, preferred_element_type=jnp.float32) + bkv_ref[...]
    k3 = kvT[:E, :].reshape(H, Dh, Lk)     # K^T per head: (H, Dh, Lk)
    v3 = kvT[E:, :].reshape(H, Dh, Lk)     # V^T per head: (H, Dh, Lk)

    # ---- head-batched attention -------------------------------------------
    # scores: standard batched matmul  (H, Lq, Dh) x (H, Dh, Lk) -> (H, Lq, Lk)
    s = jnp.einsum("hqd,hdk->hqk", q3, k3, preferred_element_type=jnp.float32)
    s = s - jnp.max(s, axis=-1, keepdims=True)
    p = jnp.exp(s)
    p = p * pl.reciprocal(jnp.sum(p, axis=-1, keepdims=True), approx=True)
    # o^T per head: contraction over k with V kept transposed -> (H, Dh, Lq)
    oT = jnp.einsum("hdk,hqk->hdq", v3, p, preferred_element_type=jnp.float32)

    # Merge heads (leading-dim reshape, free): attn^T = (E, Lq)
    attnT = oT.reshape(E, Lq)

    # ---- output projection, still feature-major ---------------------------
    # out^T = Wo @ attn^T + bo[:, None]                -> (E, Lq)
    outT = jnp.dot(wo_ref[...], attnT, preferred_element_type=jnp.float32) + bo_ref[...]
    # NOTE: last dim E=32 < 128 lanes -> partially masked stores; for large
    # Lq*E present the output as a lane-dense slab instead.
    out_ref[0] = outT.T.astype(out_ref.dtype)


def multimodal_self_attention(temporal_data, meta_data, params, n_heads):
    """temporal_data: (B, Lq, E)  meta_data: (B, E, Lk)  ->  (B, Lq, E)."""
    B, Lq, E = temporal_data.shape
    assert meta_data.shape[0] == B and meta_data.shape[1] == E
    assert E % n_heads == 0, "d_model must be divisible by n_heads"
    Lk = meta_data.shape[2]
    Dh = E // n_heads
    scale = 1.0 / math.sqrt(Dh)
    f32 = jnp.float32

    # One-time parameter prep (outside the kernel, amortized over all calls):
    #   * 1/sqrt(Dh) folded into Wq and bq,
    #   * K/V weights & biases packed into a single fused operand,
    #   * all weights kept in the orientation the kernel consumes directly
    #     (no in-kernel transposes of any parameter).
    wq = (params["wq"] * scale).astype(f32)                                  # (E, E)
    bq = (params["bq"] * scale).reshape(E, 1).astype(f32)                    # (E, 1)
    wkv = jnp.concatenate([params["wk"], params["wv"]], axis=0).astype(f32)  # (2E, E)
    bkv = jnp.concatenate([params["bk"], params["bv"]], axis=0).reshape(2 * E, 1).astype(f32)
    wo = params["wo"].astype(f32)                                            # (E, E)
    bo = params["bo"].reshape(E, 1).astype(f32)                              # (E, 1)

    full2d = lambda shape: pl.BlockSpec(shape, lambda b: (0, 0))

    out = pl.pallas_call(
        functools.partial(_mha_kernel, n_heads=n_heads),
        out_shape=jax.ShapeDtypeStruct((B, Lq, E), temporal_data.dtype),
        grid_spec=pltpu.PrefetchScalarGridSpec(
            num_scalar_prefetch=0,
            grid=(B,),
            in_specs=[
                pl.BlockSpec((1, Lq, E), lambda b: (b, 0, 0)),   # temporal
                pl.BlockSpec((1, E, Lk), lambda b: (b, 0, 0)),   # meta (native layout)
                full2d((E, E)), full2d((E, 1)),                  # wq, bq (scaled)
                full2d((2 * E, E)), full2d((2 * E, 1)),          # fused wkv, bkv
                full2d((E, E)), full2d((E, 1)),                  # wo, bo
            ],
            out_specs=pl.BlockSpec((1, Lq, E), lambda b: (b, 0, 0)),
        ),
        compiler_params=pltpu.CompilerParams(
            dimension_semantics=("parallel",),
            vmem_limit_bytes=32 * 1024 * 1024,
        ),
    )(temporal_data, meta_data, wq, bq, wkv, bkv, wo, bo)
    return out


def _reference(temporal_data, meta_data, params, n_heads):
    """Pure-JAX reference of nn.MultiheadAttention forward (eval mode)."""
    meta_bf = jnp.transpose(meta_data, (0, 2, 1))
    E = temporal_data.shape[-1]
    Dh = E // n_heads
    scale = 1.0 / math.sqrt(Dh)
    q = temporal_data @ params["wq"].T + params["bq"]
    k = meta_bf @ params["wk"].T + params["bk"]
    v = meta_bf @ params["wv"].T + params["bv"]
    B, Lq, _ = q.shape
    Lk = k.shape[1]
    q = q.reshape(B, Lq, n_heads, Dh).transpose(0, 2, 1, 3) * scale
    k = k.reshape(B, Lk, n_heads, Dh).transpose(0, 2, 1, 3)
    v = v.reshape(B, Lk, n_heads, Dh).transpose(0, 2, 1, 3)
    s = jnp.einsum("bhqd,bhkd->bhqk", q, k)
    p = jax.nn.softmax(s, axis=-1)
    o = jnp.einsum("bhqk,bhkd->bhqd", p, v)
    o = o.transpose(0, 2, 1, 3).reshape(B, Lq, E)
    return o @ params["wo"].T + params["bo"]


if __name__ == "__main__":
    # Small shapes consistent with the module's forward:
    #   temporal_data: (B, Lq, d_model), meta_data: (B, d_model, Lk)
    B, Lq, Lk = 2, 8, 8
    d_model, n_heads = 32, 4
    dropout = 0.1  # inference -> identity

    key = jax.random.PRNGKey(0)
    k_t, k_m, k_in, k_bi, k_wo, k_bo = jax.random.split(key, 6)

    temporal = jax.random.normal(k_t, (B, Lq, d_model), dtype=jnp.float32)
    meta = jax.random.normal(k_m, (B, d_model, Lk), dtype=jnp.float32)

    # Deterministic parameter init (shapes match nn.MultiheadAttention):
    # in_proj_weight (3E, E) split into Wq/Wk/Wv; in_proj_bias (3E); out_proj (E, E)+(E,).
    in_proj_w = 0.1 * jax.random.normal(k_in, (3 * d_model, d_model), dtype=jnp.float32)
    in_proj_b = 0.1 * jax.random.normal(k_bi, (3 * d_model,), dtype=jnp.float32)
    params = {
        "wq": in_proj_w[:d_model],
        "wk": in_proj_w[d_model:2 * d_model],
        "wv": in_proj_w[2 * d_model:],
        "bq": in_proj_b[:d_model],
        "bk": in_proj_b[d_model:2 * d_model],
        "bv": in_proj_b[2 * d_model:],
        "wo": 0.1 * jax.random.normal(k_wo, (d_model, d_model), dtype=jnp.float32),
        "bo": 0.1 * jax.random.normal(k_bo, (d_model,), dtype=jnp.float32),
    }

    out = multimodal_self_attention(temporal, meta, params, n_heads)
    out = jax.block_until_ready(out)

    ref = _reference(temporal, meta, params, n_heads)
    assert out.shape == (B, Lq, d_model)
    # Tolerance accounts for the approximate EUP reciprocal in the softmax.
    err = float(jnp.max(jnp.abs(out - ref)))
    assert jnp.allclose(out, ref, atol=5e-3, rtol=1e-2), err

    print("KERNEL_OK")
</pallas_src>

<mosaic_0001>
module attributes {stable_mosaic.version = 11 : i64} {
  func.func @_mha_kernel(%arg0: i32, %arg1: memref<1x8x32xf32, #tpu.memory_space<vmem>>, %arg2: memref<1x32x8xf32, #tpu.memory_space<vmem>>, %arg3: memref<32x32xf32, #tpu.memory_space<vmem>>, %arg4: memref<32x1xf32, #tpu.memory_space<vmem>>, %arg5: memref<64x32xf32, #tpu.memory_space<vmem>>, %arg6: memref<64x1xf32, #tpu.memory_space<vmem>>, %arg7: memref<32x32xf32, #tpu.memory_space<vmem>>, %arg8: memref<32x1xf32, #tpu.memory_space<vmem>>, %arg9: memref<1x8x32xf32, #tpu.memory_space<vmem>>) attributes {dimension_semantics = [#tpu.dimension_semantics<parallel>], iteration_bounds = array<i64: 2>, scalar_prefetch = 0 : i64, scratch_operands = 0 : i64, tpu.core_type = #tpu.core_type<tc>, window_params = [{transform_indices = @transform_0, window_bounds = array<i64: 1, 8, 32>}, {transform_indices = @transform_1, window_bounds = array<i64: 1, 32, 8>}, {pipeline_mode = #tpu.pipeline_mode<synchronous>, transform_indices = @transform_2, window_bounds = array<i64: 32, 32>}, {pipeline_mode = #tpu.pipeline_mode<synchronous>, transform_indices = @transform_3, window_bounds = array<i64: 32, 1>}, {pipeline_mode = #tpu.pipeline_mode<synchronous>, transform_indices = @transform_4, window_bounds = array<i64: 64, 32>}, {pipeline_mode = #tpu.pipeline_mode<synchronous>, transform_indices = @transform_5, window_bounds = array<i64: 64, 1>}, {pipeline_mode = #tpu.pipeline_mode<synchronous>, transform_indices = @transform_6, window_bounds = array<i64: 32, 32>}, {pipeline_mode = #tpu.pipeline_mode<synchronous>, transform_indices = @transform_7, window_bounds = array<i64: 32, 1>}, {transform_indices = @transform_8, window_bounds = array<i64: 1, 8, 32>}]} {
    %c0 = arith.constant 0 : index
    %c0_0 = arith.constant 0 : index
    %c0_1 = arith.constant 0 : index
    %0 = vector.load %arg1[%c0, %c0_0, %c0_1] : memref<1x8x32xf32, #tpu.memory_space<vmem>>, vector<1x8x32xf32>
    %1 = vector.shape_cast %0 : vector<1x8x32xf32> to vector<8x32xf32>
    %c0_2 = arith.constant 0 : index
    %c0_3 = arith.constant 0 : index
    %c0_4 = arith.constant 0 : index
    %2 = vector.load %arg2[%c0_2, %c0_3, %c0_4] : memref<1x32x8xf32, #tpu.memory_space<vmem>>, vector<1x32x8xf32>
    %3 = vector.shape_cast %2 : vector<1x32x8xf32> to vector<32x8xf32>
    %c0_5 = arith.constant 0 : index
    %c0_6 = arith.constant 0 : index
    %4 = vector.load %arg3[%c0_5, %c0_6] : memref<32x32xf32, #tpu.memory_space<vmem>>, vector<32x32xf32>
    %5 = tpu.transpose %1, [1, 0] : vector<8x32xf32> -> vector<32x8xf32>
    %cst = arith.constant dense<0.000000e+00> : vector<32x8xf32>
    %6 = tpu.matmul %4, %5, %cst {dimension_numbers = #tpu.dot_dimension_numbers<[1], [0], [0], [1], [0, 0, 1, 1], [], []>} : vector<32x32xf32>, vector<32x8xf32>, vector<32x8xf32> -> vector<32x8xf32>
    %c0_7 = arith.constant 0 : index
    %c0_8 = arith.constant 0 : index
    %7 = vector.load %arg4[%c0_7, %c0_8] : memref<32x1xf32, #tpu.memory_space<vmem>>, vector<32x1xf32>
    %8 = vector.broadcast %7 : vector<32x1xf32> to vector<32x8xf32>
    %9 = arith.addf %6, %8 : vector<32x8xf32>
    %10 = vector.shape_cast %9 : vector<32x8xf32> to vector<4x8x8xf32>
    %11 = tpu.transpose %10, [0, 2, 1] : vector<4x8x8xf32> -> vector<4x8x8xf32>
    %c0_9 = arith.constant 0 : index
    %c0_10 = arith.constant 0 : index
    %12 = vector.load %arg5[%c0_9, %c0_10] : memref<64x32xf32, #tpu.memory_space<vmem>>, vector<64x32xf32>
    %cst_11 = arith.constant dense<0.000000e+00> : vector<64x8xf32>
    %13 = tpu.matmul %12, %3, %cst_11 {dimension_numbers = #tpu.dot_dimension_numbers<[1], [0], [0], [1], [0, 0, 1, 1], [], []>} : vector<64x32xf32>, vector<32x8xf32>, vector<64x8xf32> -> vector<64x8xf32>
    %c0_12 = arith.constant 0 : index
    %c0_13 = arith.constant 0 : index
    %14 = vector.load %arg6[%c0_12, %c0_13] : memref<64x1xf32, #tpu.memory_space<vmem>>, vector<64x1xf32>
    %15 = vector.broadcast %14 : vector<64x1xf32> to vector<64x8xf32>
    %16 = arith.addf %13, %15 : vector<64x8xf32>
    %17 = vector.extract_strided_slice %16 {offsets = [0, 0], sizes = [32, 8], strides = [1, 1]} : vector<64x8xf32> to vector<32x8xf32>
    %18 = vector.shape_cast %17 : vector<32x8xf32> to vector<4x8x8xf32>
    %19 = vector.extract_strided_slice %16 {offsets = [32, 0], sizes = [32, 8], strides = [1, 1]} : vector<64x8xf32> to vector<32x8xf32>
    %20 = vector.shape_cast %19 : vector<32x8xf32> to vector<4x8x8xf32>
    "tpu.trace_start"() <{level = 10 : i32, message = "hqd,hdk->hqk"}> : () -> ()
    %cst_14 = arith.constant dense<0.000000e+00> : vector<4x8x8xf32>
    %21 = tpu.matmul %11, %18, %cst_14 {dimension_numbers = #tpu.dot_dimension_numbers<[2], [1], [1], [2], [0, 0, 0, 1, 1, 2], [0], [0]>} : vector<4x8x8xf32>, vector<4x8x8xf32>, vector<4x8x8xf32> -> vector<4x8x8xf32>
    "tpu.trace_stop"() : () -> ()
    %cst_15 = arith.constant dense<0xFF800000> : vector<4x8xf32>
    %22 = vector.multi_reduction <maximumf>, %21, %cst_15 [2] : vector<4x8x8xf32> to vector<4x8xf32>
    %23 = vector.shape_cast %22 : vector<4x8xf32> to vector<4x8x1xf32>
    %24 = vector.broadcast %23 : vector<4x8x1xf32> to vector<4x8x8xf32>
    %25 = arith.subf %21, %24 : vector<4x8x8xf32>
    %26 = math.exp %25 : vector<4x8x8xf32>
    %cst_16 = arith.constant dense<0.000000e+00> : vector<4x8xf32>
    %27 = vector.multi_reduction <add>, %26, %cst_16 [2] : vector<4x8x8xf32> to vector<4x8xf32>
    %28 = vector.shape_cast %27 : vector<4x8xf32> to vector<4x8x1xf32>
    %29 = tpu.reciprocal %28 {approx = true} : vector<4x8x1xf32> -> vector<4x8x1xf32>
    %30 = vector.broadcast %29 : vector<4x8x1xf32> to vector<4x8x8xf32>
    %31 = arith.mulf %26, %30 : vector<4x8x8xf32>
    "tpu.trace_start"() <{level = 10 : i32, message = "hdk,hqk->hdq"}> : () -> ()
    %cst_17 = arith.constant dense<0.000000e+00> : vector<4x8x8xf32>
    %32 = tpu.matmul %20, %31, %cst_17 {dimension_numbers = #tpu.dot_dimension_numbers<[2], [2], [1], [1], [0, 0, 0, 1, 1, 1], [0], [0]>} : vector<4x8x8xf32>, vector<4x8x8xf32>, vector<4x8x8xf32> -> vector<4x8x8xf32>
    "tpu.trace_stop"() : () -> ()
    %33 = vector.shape_cast %32 : vector<4x8x8xf32> to vector<32x8xf32>
    %c0_18 = arith.constant 0 : index
    %c0_19 = arith.constant 0 : index
    %34 = vector.load %arg7[%c0_18, %c0_19] : memref<32x32xf32, #tpu.memory_space<vmem>>, vector<32x32xf32>
    %cst_20 = arith.constant dense<0.000000e+00> : vector<32x8xf32>
    %35 = tpu.matmul %34, %33, %cst_20 {dimension_numbers = #tpu.dot_dimension_numbers<[1], [0], [0], [1], [0, 0, 1, 1], [], []>} : vector<32x32xf32>, vector<32x8xf32>, vector<32x8xf32> -> vector<32x8xf32>
    %c0_21 = arith.constant 0 : index
    %c0_22 = arith.constant 0 : index
    %36 = vector.load %arg8[%c0_21, %c0_22] : memref<32x1xf32, #tpu.memory_space<vmem>>, vector<32x1xf32>
    %37 = vector.broadcast %36 : vector<32x1xf32> to vector<32x8xf32>
    %38 = arith.addf %35, %37 : vector<32x8xf32>
    %39 = tpu.transpose %38, [1, 0] : vector<32x8xf32> -> vector<8x32xf32>
    %c0_23 = arith.constant 0 : index
    %c0_24 = arith.constant 0 : index
    %c0_25 = arith.constant 0 : index
    %40 = vector.load %arg9[%c0_23, %c0_24, %c0_25] : memref<1x8x32xf32, #tpu.memory_space<vmem>>, vector<1x8x32xf32>
    %41 = vector.shape_cast %40 : vector<1x8x32xf32> to vector<8x32xf32>
    %42 = vector.shape_cast %39 : vector<8x32xf32> to vector<1x8x32xf32>
    tpu.vector_store %arg9[%c0_23, %c0_24, %c0_25], %42 {strides = array<i32>} : memref<1x8x32xf32, #tpu.memory_space<vmem>>, vector<1x8x32xf32>,
    return
  }
  func.func @transform_0(%arg0: i32) -> (i32, i32, i32) {
    %c0_i32 = arith.constant 0 : i32
    %c0_i32_0 = arith.constant 0 : i32
    %c0_i32_1 = arith.constant 0 : i32
    return %arg0, %c0_i32, %c0_i32_0 : i32, i32, i32
  }
  func.func @transform_1(%arg0: i32) -> (i32, i32, i32) {
    %c0_i32 = arith.constant 0 : i32
    %c0_i32_0 = arith.constant 0 : i32
    %c0_i32_1 = arith.constant 0 : i32
    return %arg0, %c0_i32, %c0_i32_0 : i32, i32, i32
  }
  func.func @transform_2(%arg0: i32) -> (i32, i32) {
    %c0_i32 = arith.constant 0 : i32
    %c0_i32_0 = arith.constant 0 : i32
    %c0_i32_1 = arith.constant 0 : i32
    return %c0_i32, %c0_i32_0 : i32, i32
  }
  func.func @transform_3(%arg0: i32) -> (i32, i32) {
    %c0_i32 = arith.constant 0 : i32
    %c0_i32_0 = arith.constant 0 : i32
    %c0_i32_1 = arith.constant 0 : i32
    return %c0_i32, %c0_i32_0 : i32, i32
  }
  func.func @transform_4(%arg0: i32) -> (i32, i32) {
    %c0_i32 = arith.constant 0 : i32
    %c0_i32_0 = arith.constant 0 : i32
    %c0_i32_1 = arith.constant 0 : i32
    return %c0_i32, %c0_i32_0 : i32, i32
  }
  func.func @transform_5(%arg0: i32) -> (i32, i32) {
    %c0_i32 = arith.constant 0 : i32
    %c0_i32_0 = arith.constant 0 : i32
    %c0_i32_1 = arith.constant 0 : i32
    return %c0_i32, %c0_i32_0 : i32, i32
  }
  func.func @transform_6(%arg0: i32) -> (i32, i32) {
    %c0_i32 = arith.constant 0 : i32
    %c0_i32_0 = arith.constant 0 : i32
    %c0_i32_1 = arith.constant 0 : i32
    return %c0_i32, %c0_i32_0 : i32, i32
  }
  func.func @transform_7(%arg0: i32) -> (i32, i32) {
    %c0_i32 = arith.constant 0 : i32
    %c0_i32_0 = arith.constant 0 : i32
    %c0_i32_1 = arith.constant 0 : i32
    return %c0_i32, %c0_i32_0 : i32, i32
  }
  func.func @transform_8(%arg0: i32) -> (i32, i32, i32) {
    %c0_i32 = arith.constant 0 : i32
    %c0_i32_0 = arith.constant 0 : i32
    %c0_i32_1 = arith.constant 0 : i32
    return %arg0, %c0_i32, %c0_i32_0 : i32, i32, i32
  }
}

</mosaic_0001>

<bundles_post_ra>
// kernel: tpu_custom_call.1
= control target key start
LH: loop header
LB: loop body
LE: loop exit
PB: predicated region body
PF: predicated region fallthrough
CT: control target
= control target key end

     0   :  { %13 = vsyncpa [#allocation3], 0  ;;  %s2275_s0 = inlined_call_operand.vmem [shape: f32[2,8,32], index: 0, kind: input, shape index: {}]   ;;  %s2276_s1 = inlined_call_operand.vmem [shape: f32[2,32,8], index: 1, kind: input, shape index: {}]   ;;  %s2277_s2 = inlined_call_operand.vmem [shape: f32[32,32], index: 2, kind: input, shape index: {}]   ;;  %s2278_s3 = inlined_call_operand.vmem [shape: f32[32,1], index: 3, kind: input, shape index: {}]   ;;  %s2279_s4 = inlined_call_operand.vmem [shape: f32[64,32], index: 4, kind: input, shape index: {}]   ;;  %s2280_s5 = inlined_call_operand.vmem [shape: f32[64,1], index: 5, kind: input, shape index: {}]   ;;  %s2281_s6 = inlined_call_operand.vmem [shape: f32[32,32], index: 6, kind: input, shape index: {}]   ;;  %s2282_s7 = inlined_call_operand.vmem [shape: f32[32,1], index: 7, kind: input, shape index: {}]   ;;  %s2283_s8 = inlined_call_operand.hbm [shape: f32[2,8,32], index: 8, kind: output, shape index: {}]  }
   0x1   :  { %15 = vsyncpa [#allocation3 + $0x1], 0  ;;  %s2010_s27 = smov 0   ;;  %s2012_s28 = smov 0  }
   0x2   :  { %s2014_s29 = smov 0   ;;  %s2016_s30 = smov 0  }
   0x3 LB: > { %2285 = sst [smem:[#allocation5_spill]] %s1955_s29  ;;  %s2031_s9 = sadd.s32 4294967295, %s1959_s30   ;;  %s1959_s30 = sphi %s2016_s30, %s2293_s30   ;;  %s1955_s29 = sphi %s2014_s29, %s2290_s29   ;;  %s1951_s28 = sphi %s2012_s28, %s2292_s28   ;;  %s1947_s27 = sphi %s2010_s27, %s2291_s27  }
   0x4   : > { %s1652_s10 = sadd.s32 4294967294, %s1959_s30   ;;  %s2035_s11 = sadd.s32 1, %s1959_s30  }
   0x5   : > { %s206_s12 = sadd.s32 1, %s1955_s29  ;;  %s203_s13 = ssub.s32 %s1959_s30, %s2035_s11 }
   0x6   : > { %p216_p0 = scmp.ne.s32.totalorder %s1955_s29, %s1951_s28  ;;  %p204_p1 = scmp.eq.s32.totalorder %s203_s13, 0 }
   0x7   : > { %p217_p2 = scmp.eq.s32.totalorder %s2031_s9, 1  ;;  %p222_p3 = scmp.ne.s32.totalorder %s1951_s28, %s1947_s27 }
   0x8   : > { %p223_p4 = scmp.eq.s32.totalorder %s1652_s10, 1  ;;  %p1655_p7 = scmp.ge.s32.totalorder %s1959_s30, 1 }
   0x9   : > { %s2046_s14 = scalar_select %p204_p1, %s1955_s29, %s206_s12  }
   0xa   : > { %p2048_p5 = por %p217_p2, %p216_p0  ;;  %p2052_p6 = por %p223_p4, %p222_p3 }
   0xb   : > { %2286 = sst [smem:[#allocation6_spill]] %s2046_s14  ;;  %p274_p8 = scmp.lt.s32.totalorder %s1959_s30, 3 }
   0xd   : > { %p275_p9 = pnand %p1655_p7, %p274_p8 }
   0xe   : > { %p312_p10 = scmp.lt.s32.totalorder (!%p275_p9), %s2031_s9, 1  ;;  %vm354_vm0 = vcmask (!%p275_p9), 261120   ;;  %v326_v0 = vld [vmem:[%s2277_s2] sm:$0xff] (!%p275_p9)  ;;  %v585_v1 = vld [vmem:[%s2279_s4 + $0x10] sm:$0xff] (!%p275_p9)  ;;  %v1961_v2 = vmov (!%p275_p9), 0   ;;  %v331_v5 = vld [vmem:[%s2278_s3 + $0x8] sm:$0xff] (!%p275_p9) }
   0xf   : > { %278 = sbr.rel (%p275_p9) target bundleno = 1492 (0x5d4), region = 52  ;;  %1737 = vmatprep.mubr.msk.f32.mxu0 (!%p275_p9), %vm354_vm0, %v326_v0  ;;  %1879 = vset.pattern.permute.xlu0 (!%p275_p9), %v1961_v2  ;;  %v330_v3 = vld [vmem:[%s2278_s3] sm:$0xff] (!%p275_p9)  ;;  %v332_v4 = vld [vmem:[%s2278_s3 + $0x10] sm:$0xff] (!%p275_p9)  ;;  %v333_v6 = vld [vmem:[%s2278_s3 + $0x18] sm:$0xff] (!%p275_p9)  ;;  %v1962_v24 = vmov (!%p275_p9), 0.0   ;;  %vm1963_vm1 = vmmov (!%p275_p9), 0  }
  0x10   : > { %1754 = vmatprep.mubr.msk.f32.mxu1 (!%p275_p9), %vm354_vm0, %v585_v1  ;;  %1880 = vset.pattern.permute.xlu1 (!%p275_p9), %v1961_v2  ;;  %v327_v13 = vld [vmem:[%s2277_s2 + $0x8] sm:$0xff] (!%p275_p9)  ;;  %v328_v15 = vld [vmem:[%s2277_s2 + $0x10] sm:$0xff] (!%p275_p9)  ;;  %v591_v16 = vld [vmem:[%s2280_s5] sm:$0xff] (!%p275_p9)  ;;  %vm768_vm2 = vcmask (!%p275_p9), 64512   ;;  %s309_s12 = sand.u32 (!%p275_p9), 1, %s1951_s28   ;;  %s1690_s17 = sshll.u32 (!%p275_p9), %s2031_s9, 7 }
  0x11   : > { %336 = vperm.xlu0 (!%p275_p9), %1879, %v330_v3   ;;  %346 = vperm.xlu1 (!%p275_p9), %1880, %v332_v4   ;;  %v592_v17 = vld [vmem:[%s2280_s5 + $0x8] sm:$0xff] (!%p275_p9)  ;;  %v329_v18 = vld [vmem:[%s2277_s2 + $0x18] sm:$0xff] (!%p275_p9)  ;;  %v583_v19 = vld [vmem:[%s2279_s4] sm:$0xff] (!%p275_p9)  ;;  %s1656_s13 = sshll.u32 (!%p275_p9), %s309_s12, 3 }
  0x12   : > { %v586_v20 = vld [vmem:[%s2279_s4 + $0x18] sm:$0xff] (!%p275_p9)  ;;  %v593_v21 = vld [vmem:[%s2280_s5 + $0x10] sm:$0xff] (!%p275_p9)  ;;  %v584_v23 = vld [vmem:[%s2279_s4 + $0x8] sm:$0xff] (!%p275_p9)  ;;  %s311_s18 = scalar_lea.vmem (!%p275_p9), [#allocation2], %s1656_s13 }
  0x13   : > { %v594_v22 = vld [vmem:[%s2280_s5 + $0x18] sm:$0xff] (!%p275_p9)  ;;  %v587_v43 = vld [vmem:[%s2279_s4 + $0x20] sm:$0xff] (!%p275_p9)  ;;  %v588_v44 = vld [vmem:[%s2279_s4 + $0x28] sm:$0xff] (!%p275_p9) }
  0x14   : > { %v589_v55 = vld [vmem:[%s2279_s4 + $0x30] sm:$0xff] (!%p275_p9)  ;;  %v590_v56 = vld [vmem:[%s2279_s4 + $0x38] sm:$0xff] (!%p275_p9) }
  0x15   : > { %341 = vperm.xlu0 (!%p275_p9), %1879, %v331_v5   ;;  %351 = vperm.xlu1 (!%p275_p9), %1880, %v333_v6   ;;  %v595_v5 = vld [vmem:[%s2280_s5 + $0x20] sm:$0xff] (!%p275_p9) }
  0x16   : > { %s313_s21 = scalar_select %p312_p10, %s2031_s9, 1 }
  0x17   : > { %s1964_s9 = smov [#allocation2]  }
  0x18   : > { %s1657_s26 = sshll.u32 %s313_s21, 3  ;;  %s1693_s10 = sshll.u32 %s313_s21, 5 }
  0x19   : > { %s315_s19 = scalar_lea.vmem %s2275_s0, %s1657_s26  ;;  %s320_s23 = scalar_lea.vmem %s2276_s1, %s1693_s10  ;;  %601 = vperm.xlu0 %1879, %v591_v16   ;;  %606 = vperm.xlu1 %1880, %v592_v17  }
  0x1a   : > { %v321_v7 = vld [vmem:[%s315_s19] sm:$0xff]  ;;  %v323_v9 = vld [vmem:[%s320_s23 + $0x8] sm:$0xff]  ;;  %v324_v11 = vld [vmem:[%s320_s23 + $0x10] sm:$0xff]  ;;  %s1581_s19 = sshll.u32 %s311_s18, 4  ;;  %s1568_s21 = scalar_lea.sflag [#allocation3], %s309_s12  ;;  %s2234_s19 = int_to_ptr.vmem [resolvable:$true] %s1581_s19 }
  0x1b   : > { %v322_v8 = vld [vmem:[%s320_s23] sm:$0xff]  ;;  %1735 = vmatprep.subr.msk.mxu0 %vm354_vm0, %v321_v7  ;;  %v325_v12 = vld [vmem:[%s320_s23 + $0x18] sm:$0xff]  ;;  %s2232_s23 = scalar_lea.hbm %s2283_s8, %s1690_s17  ;;  %s1897_s24 = scalar_lea.vmem %s2234_s19, 128 }
  0x1c   : > { %v1817_v10 = vpack.c.bf16 %v323_v9, %v322_v8  ;;  %1736 = vmatpush3.xpose.msk.msra.mxu0 %vm354_vm0, %v321_v7  ;;  %v1821_v14 = vpack.c.bf16 %v325_v12, %v324_v11  ;;  %p1898_p11 = scmp.ne.s32.totalorder %s2234_s19, %s1897_s24  ;;  %s1901_s29 = sshll.u32 %s1964_s9, 4  ;;  %s1902_s29 = int_to_ptr.vmem [resolvable:$false] %s1901_s29 }
  0x1d   : > { %611 = vperm.xlu0 %1879, %v593_v21   ;;  %616 = vperm.xlu1 %1880, %v594_v22   ;;  %s1903_s14 = scalar_lea.vmem %s1902_s29, 256  ;;  %p1904_p0 = scmp.lt.s32.totalorder %s2234_s19, %s1902_s29 }
  0x1e   : > { %1833 = vmatprep.subr.bf16.mxu1 %v1817_v10  ;;  %1818 = vmatprep.subr.bf16.mxu0 %v1817_v10  ;;  %p1899_p12 = pnand %p1898_p11, %p2048_p5  ;;  %p1905_p1 = scmp.lt.s32.totalorder %s1903_s14, %s1897_s24 }
  0x1f   : > { %1835 = vmatpush3.bf16.msra.mxu1 %v1817_v10  ;;  %1738 = vmatmul.mubr.msk.f32.vlgmr.msra.gmra.mrb[0].mxu0 %vm354_vm0, %v327_v13 }
  0x20   : > { %1834 = vmatprep.subr.bf16.mxu1 %v1821_v14  ;;  %1820 = vmatpush3.bf16.msra.mxu0 %v1817_v10  ;;  %p1900_p13 = pneg %p1899_p12  ;;  %p1906_p2 = por %p1905_p1, %p1904_p0 }
  0x21   : > { %1740 = vmatprep.mubr.msk.f32.mxu0 %vm354_vm0, %v328_v15  ;;  %1822 = vmatprep.subr.bf16.mxu0 %v1821_v14 }
  0x22   : > { %p1907_p3 = pnand %p1906_p2, %p1900_p13 }
  0x23   : > { %1836 = vmatpush3.bf16.msra.mxu1 %v1821_v14  ;;  %1741 = vmatmul.mubr.msk.f32.gmra.mrb[2].mxu0 %vm354_vm0, %v329_v18 }
  0x24   : > { %1824 = vmatpush3.bf16.msra.mxu0 %v1821_v14  ;;  %1751 = vmatprep.mubr.msk.f32.mxu0 %vm354_vm0, %v583_v19 }
  0x25   : > { %1763 = vmatprep.subr.mxu0 %v1962_v24  ;;  %1783 = vmatprep.subr.mxu1 %v1962_v24 }
  0x26   : > { %1755 = vmatmul.mubr.msk.f32.vlgmr.msra.gmra.mrb[0].mxu1 %vm354_vm0, %v586_v20 }
  0x27   : > { %1752 = vmatmul.mubr.msk.f32.vlgmr.msra.gmra.mrb[4].mxu0 %vm354_vm0, %v584_v23  ;;  %1757 = vmatprep.mubr.msk.f32.mxu1 %vm354_vm0, %v587_v43 }
  0x28   : > { %1765 = vmatprep.mubr.msk.f32.mxu0 %vm1963_vm1, %v1962_v24 }
  0x2a   : > { %1758 = vmatmul.mubr.msk.f32.gmra.mrb[2].mxu1 %vm354_vm0, %v588_v44 }
  0x2b   : > { %1760 = vmatprep.mubr.msk.f32.mxu1 %vm354_vm0, %v589_v55 }
  0x2e   : > { %1761 = vmatmul.mubr.msk.f32.gmra.mrb[4].mxu1 %vm354_vm0, %v590_v56 }
  0x2f   : > { %1785 = vmatprep.mubr.msk.f32.mxu1 %vm1963_vm1, %v1962_v24 }
  0x90   : > { %v337_v25 = vpop.permute.xlu0 %336  ;;  %v347_v28 = vpop.permute.xlu1 %346 }
  0x94   : > { %v342_v26 = vpop.permute.xlu0 %341  ;;  %v352_v36 = vpop.permute.xlu1 %351 }
  0x98   : > { %v602_v40 = vpop.permute.xlu0 %601  ;;  %v607_v45 = vpop.permute.xlu1 %606 }
  0x9c   : > { %v612_v46 = vpop.permute.xlu0 %611  ;;  %v617_v47 = vpop.permute.xlu1 %616 }
  0xf2   : > { %v1739_v27 = vpop.f32.mrb[0].mxu0 }
  0xf3   : > { %v442_v29 = vadd.f32 %v1739_v27, %v342_v26  ;;  %v436_v30 = vpop.f32.mrb[1].mxu0 }
  0xf4   : > { %v437_v31 = vadd.f32 %v436_v30, %v337_v25 }
  0xf5   : > { %487 = vxpose.xlu1.b32.start.end [1/1] (short) (narrow) %v442_v29, 8  ;;  %v597_v29 = vld [vmem:[%s2280_s5 + $0x30] sm:$0xff] }
  0xf6   : > { %v1742_v32 = vpop.f32.mrb[2].mxu0  ;;  %455 = vxpose.xlu0.b32.start.end [1/1] (short) (narrow) %v437_v31, 8  ;;  %v598_v31 = vld [vmem:[%s2280_s5 + $0x38] sm:$0xff] }
  0xf7   : > { %v446_v33 = vpop.f32.mrb[3].mxu0  ;;  %v452_v38 = vadd.f32 %v1742_v32, %v352_v36  ;;  %v1413_v36 = vld [vmem:[%s2282_s7] sm:$0xff] }
  0xf8   : > { %v447_v34 = vadd.f32 %v446_v33, %v347_v28  ;;  %v1414_v33 = vld [vmem:[%s2282_s7 + $0x8] sm:$0xff] }
  0xf9   : > { %v1756_v35 = vpop.f32.mrb[0].mxu1 }
  0xfa   : > { %v739_v37 = vpop.f32.mrb[1].mxu1  ;;  %v1753_v39 = vpop.f32.mrb[4].mxu0  ;;  %519 = vxpose.xlu0.b32.start.end [1/1] (short) (narrow) %v447_v34, 8  ;;  %v745_v53 = vadd.f32 %v1756_v35, %v617_v47  ;;  %v596_v34 = vld [vmem:[%s2280_s5 + $0x28] sm:$0xff]  ;;  %v1416_v35 = vld [vmem:[%s2282_s7 + $0x18] sm:$0xff] }
  0xfb   : > { %v729_v41 = vpop.f32.mrb[5].mxu0  ;;  %v735_v48 = vadd.f32 %v1753_v39, %v607_v45  ;;  %v740_v51 = vadd.f32 %v739_v37, %v612_v46  ;;  %v1415_v37 = vld [vmem:[%s2282_s7 + $0x10] sm:$0xff] }
  0xfc   : > { %v730_v42 = vadd.f32 %v729_v41, %v602_v40 }
  0xfd   : > { %v2169_v6 = vpop.f32.mrb[2].mxu1 }
  0xfe   : > { %1764 = vmatpush3.msra.mxu0 %v730_v42  ;;  %551 = vxpose.xlu0.b32.start.end [1/1] (short) (narrow) %v452_v38, 8  ;;  %v749_v7 = vpop.f32.mrb[3].mxu1 }
  0xff   : > { %1768 = vmatprep.subr.mxu0 %v1962_v24 }
 0x101   : > { %v1762_v30 = vpop.f32.mrb[4].mxu1 }
 0x102   : > { %v759_v32 = vpop.f32.mrb[5].mxu1 }
 0x175   : > { %v503_v50 = vpop.trf.xlu1 }
 0x176   : > { %v471_v49 = vpop.trf.xlu0 }
 0x177   : > { %1766 = vmatmul.mubr.msk.f32.vlgmr.msra.gmra.mrb[6].mxu0 %vm768_vm2, %v471_v49 }
 0x178   : > { %1769 = vmatpush3.msra.mxu0 %v735_v48  ;;  %1770 = vmatprep.mubr.msk.f32.mxu0 %vm1963_vm1, %v1962_v24 }
 0x179   : > { %1773 = vmatprep.subr.mxu0 %v1962_v24 }
 0x17a   : > { %v535_v52 = vpop.trf.xlu0 }
 0x17b   : > { %1771 = vmatmul.mubr.msk.f32.vlgmr.msra.gmra.mrb[8].mxu0 %vm768_vm2, %v503_v50 }
 0x17c   : > { %1774 = vmatpush3.msra.mxu0 %v740_v51  ;;  %1775 = vmatprep.mubr.msk.f32.mxu0 %vm1963_vm1, %v1962_v24 }
 0x17d   : > { %1778 = vmatprep.subr.mxu0 %v1962_v24 }
 0x17e   : > { %v567_v54 = vpop.trf.xlu0 }
 0x17f   : > { %1776 = vmatmul.mubr.msk.f32.vlgmr.msra.gmra.mrb[10].mxu0 %vm768_vm2, %v535_v52 }
 0x180   : > { %1779 = vmatpush3.msra.mxu0 %v745_v53  ;;  %1780 = vmatprep.mubr.msk.f32.mxu0 %vm1963_vm1, %v1962_v24 }
 0x181   : > { %1788 = vmatprep.subr.mxu0 %v1962_v24 }
 0x183   : > { %1781 = vmatmul.mubr.msk.f32.vlgmr.msra.gmra.mrb[12].mxu0 %vm768_vm2, %v567_v54 }
 0x184   : > { %1790 = vmatprep.mubr.msk.f32.mxu0 %vm1963_vm1, %v1962_v24 }
 0x24a   : > { %v838_v57 = vpop.f32.mrb[6].mxu0 }
 0x24b   : > { %v1767_v58 = vpop.f32.mrb[7].mxu0  ;;  %v1061_v59 = vsel %vm768_vm2, %v838_v57, -inf }
 0x24c   : > { %1062 = vmax.xlane.f32.xlu0 %v1061_v59  ;;  %v1409_v58 = vld [vmem:[%s2281_s6] sm:$0xff] }
 0x24e   : > { %v911_v60 = vpop.f32.mrb[8].mxu0 }
 0x24f   : > { %v1772_v61 = vpop.f32.mrb[9].mxu0  ;;  %v1064_v62 = vsel %vm768_vm2, %v911_v60, -inf }
 0x250   : > { %1065 = vmax.xlane.f32.xlu1 %v1064_v62 }
 0x252   : > { %v984_v63 = vpop.f32.mrb[10].mxu0 }
 0x253   : > { %v1777_v0 = vpop.f32.mrb[11].mxu0  ;;  %v1067_v1 = vsel %vm768_vm2, %v984_v63, -inf }
 0x254   : > { %1068 = vmax.xlane.f32.xlu1 %v1067_v1 }
 0x256   : > { %v1057_v2 = vpop.f32.mrb[12].mxu0 }
 0x257   : > { %v1782_v3 = vpop.f32.mrb[13].mxu0  ;;  %v1070_v4 = vsel %vm768_vm2, %v1057_v2, -inf }
 0x258   : > { %1071 = vmax.xlane.f32.xlu0 %v1070_v4  ;;  %v1410_v4 = vld [vmem:[%s2281_s6 + $0x8] sm:$0xff] }
 0x265   : > { %621 = vperm.xlu1 %1880, %v595_v5   ;;  %v1411_v5 = vld [vmem:[%s2281_s6 + $0x10] sm:$0xff] }
 0x2d9   : > { %v1063_v8 = vpop.xlane.xlu0 %1062 }
 0x2da   : > { %v1073_v9 = vsub.f32 %v838_v57, %v1063_v8 }
 0x2dc   : > { %v1077_v10 = vmul.f32 1.442695, %v1073_v9 }
 0x2dd   : > { %v1066_v11 = vpop.xlane.xlu1 %1065 }
 0x2de   : > { %1881 = vpow2.f32 %v1077_v10  ;;  %v1074_v12 = vsub.f32 %v911_v60, %v1066_v11 }
 0x2e0   : > { %v1079_v13 = vmul.f32 1.442695, %v1074_v12 }
 0x2e1   : > { %v1069_v14 = vpop.xlane.xlu1 %1068 }
 0x2e2   : > { %1883 = vpow2.f32 %v1079_v13  ;;  %v1075_v15 = vsub.f32 %v984_v63, %v1069_v14 }
 0x2e4   : > { %v1081_v16 = vmul.f32 1.442695, %v1075_v15 }
 0x2e5   : > { %v1072_v17 = vpop.xlane.xlu0 %1071  ;;  %v622_v38 = vpop.permute.xlu1 %621 }
 0x2e6   : > { %1885 = vpow2.f32 %v1081_v16  ;;  %v1076_v18 = vsub.f32 %v1057_v2, %v1072_v17  ;;  %v750_v46 = vadd.f32 %v749_v7, %v622_v38 }
 0x2e8   : > { %v1882_v19 = vpop.eup %1881  ;;  %v1083_v20 = vmul.f32 1.442695, %v1076_v18 }
 0x2e9   : > { %v1085_v21 = vsel %vm768_vm2, %v1882_v19, 0.0 }
 0x2ea   : > { %1887 = vpow2.f32 %v1083_v20  ;;  %1086 = vadd.xlane.f32.xlu1 %v1085_v21 }
 0x2ec   : > { %v1884_v22 = vpop.eup %1883 }
 0x2ed   : > { %v1088_v23 = vsel %vm768_vm2, %v1884_v22, 0.0 }
 0x2ee   : > { %1089 = vadd.xlane.f32.xlu0 %v1088_v23 }
 0x2f0   : > { %v1886_v25 = vpop.eup %1885 }
 0x2f1   : > { %v1091_v26 = vsel %vm768_vm2, %v1886_v25, 0.0 }
 0x2f2   : > { %1092 = vadd.xlane.f32.xlu1 %v1091_v26 }
 0x2f4   : > { %v1888_v27 = vpop.eup %1887 }
 0x2f5   : > { %v1094_v28 = vsel %vm768_vm2, %v1888_v27, 0.0 }
 0x2f6   : > { %1095 = vadd.xlane.f32.xlu0 %v1094_v28 }
 0x303   : > { %631 = vperm.xlu1 %1880, %v597_v29  }
 0x307   : > { %636 = vperm.xlu1 %1880, %v598_v31  }
 0x30b   : > { %1424 = vperm.xlu1 %1880, %v1414_v33  }
 0x30c   : > { %626 = vperm.xlu0 %1879, %v596_v34  }
 0x30f   : > { %1434 = vperm.xlu1 %1880, %v1416_v35  }
 0x310   : > { %1419 = vperm.xlu0 %1879, %v1413_v36  }
 0x314   : > { %1429 = vperm.xlu0 %1879, %v1415_v37  }
 0x377   : > { %v1087_v39 = vpop.xlane.xlu1 %1086 }
 0x378   : > { %1889 = vrcp.f32 %v1087_v39 }
 0x37b   : > { %v1090_v40 = vpop.xlane.xlu0 %1089 }
 0x37c   : > { %1891 = vrcp.f32 %v1090_v40 }
 0x37f   : > { %v1093_v41 = vpop.xlane.xlu1 %1092 }
 0x380   : > { %1893 = vrcp.f32 %v1093_v41 }
 0x382   : > { %v1890_v42 = vpop.eup %1889 }
 0x383   : > { %v1101_v43 = vmul.f32 %v1890_v42, %v1882_v19  ;;  %v1096_v44 = vpop.xlane.xlu0 %1095  ;;  %v632_v48 = vpop.permute.xlu1 %631 }
 0x384   : > { %1895 = vrcp.f32 %v1096_v44  ;;  %v760_v54 = vadd.f32 %v759_v32, %v632_v48 }
 0x385   : > { %1784 = vmatpush3.xpose.msk.msra.mxu1 %vm768_vm2, %v1101_v43 }
 0x386   : > { %v1892_v45 = vpop.eup %1891  ;;  %1793 = vmatprep.subr.mxu1 %v1962_v24 }
 0x387   : > { %v1102_v47 = vmul.f32 %v1892_v45, %v1884_v22  ;;  %v637_v56 = vpop.permute.xlu1 %636 }
 0x388   : > { %1786 = vmatmul.mubr.msk.f32.vlgmr.msra.gmra.mrb[6].mxu1 %vm768_vm2, %v750_v46  ;;  %v765_v57 = vadd.f32 %v1762_v30, %v637_v56 }
 0x389   : > { %1789 = vmatpush3.xpose.msk.msra.mxu0 %vm768_vm2, %v1102_v47  ;;  %1795 = vmatprep.mubr.msk.f32.mxu1 %vm1963_vm1, %v1962_v24 }
 0x38a   : > { %v1894_v49 = vpop.eup %1893  ;;  %1798 = vmatprep.subr.mxu0 %v1962_v24 }
 0x38b   : > { %v1103_v50 = vmul.f32 %v1894_v49, %v1886_v25  ;;  %v627_v51 = vpop.permute.xlu0 %626  ;;  %v1425_v12 = vpop.permute.xlu1 %1424 }
 0x38c   : > { %v755_v52 = vadd.f32 %v2169_v6, %v627_v51  ;;  %v1412_v6 = vld [vmem:[%s2281_s6 + $0x18] sm:$0xff] }
 0x38d   : > { %1794 = vmatpush3.xpose.msk.msra.mxu1 %vm768_vm2, %v1103_v50 }
 0x38e   : > { %v1896_v53 = vpop.eup %1895  ;;  %1791 = vmatmul.mubr.msk.f32.vlgmr.msra.gmra.mrb[14].mxu0 %vm768_vm2, %v755_v52 }
 0x38f   : > { %v1104_v55 = vmul.f32 %v1896_v53, %v1888_v27  ;;  %1800 = vmatprep.mubr.msk.f32.mxu0 %vm1963_vm1, %v1962_v24  ;;  %v1420_v8 = vpop.permute.xlu0 %1419  ;;  %v1435_v17 = vpop.permute.xlu1 %1434 }
 0x390   : > { %1796 = vmatmul.mubr.msk.f32.vlgmr.msra.gmra.mrb[8].mxu1 %vm768_vm2, %v760_v54 }
 0x391   : > { %1799 = vmatpush3.xpose.msk.msra.mxu0 %vm768_vm2, %v1104_v55  ;;  %1811 = vmatprep.mubr.msk.f32.mxu1 %vm354_vm0, %v1409_v58 }
 0x393   : > { %v1430_v15 = vpop.permute.xlu0 %1429 }
 0x394   : > { %1801 = vmatmul.mubr.msk.f32.vlgmr.msra.gmra.mrb[16].mxu0 %vm768_vm2, %v765_v57 }
 0x45b   : > { %v1177_v59 = vpop.f32.mrb[6].mxu1 }
 0x45c   : > { %v1787_v60 = vpop.f32.mrb[7].mxu1 }
 0x461   : > { %v1253_v61 = vpop.f32.mrb[14].mxu0 }
 0x462   : > { %v1825_v62 = vpack.c.bf16 %v1253_v61, %v1177_v59  ;;  %v1792_v63 = vpop.f32.mrb[15].mxu0 }
 0x463   : > { %v1329_v0 = vpop.f32.mrb[8].mxu1 }
 0x464   : > { %v1797_v24 = vpop.f32.mrb[9].mxu1  ;;  %1826 = vmatprep.subr.bf16.mxu1 %v1825_v62 }
 0x465   : > { %1828 = vmatpush3.bf16.msra.mxu1 %v1825_v62 }
 0x467   : > { %v1405_v1 = vpop.f32.mrb[16].mxu0 }
 0x468   : > { %v1829_v2 = vpack.c.bf16 %v1405_v1, %v1329_v0  ;;  %v1802_v3 = vpop.f32.mrb[17].mxu0 }
 0x46a   : > { %1830 = vmatprep.subr.bf16.mxu1 %v1829_v2 }
 0x46b   : > { %1832 = vmatpush3.bf16.msra.mxu1 %v1829_v2 }
 0x46e   : > { %1812 = vmatmul.mubr.msk.f32.vlgmr.msra.gmra.mrb[10].mxu1 %vm354_vm0, %v1410_v4 }
 0x46f   : > { %1814 = vmatprep.mubr.msk.f32.mxu1 %vm354_vm0, %v1411_v5 }
 0x472   : > { %1815 = vmatmul.mubr.msk.f32.gmra.mrb[12].mxu1 %vm354_vm0, %v1412_v6 }
 0x541   : > { %v1813_v7 = vpop.f32.mrb[10].mxu1 }
 0x542   : > { %v1515_v9 = vpop.f32.mrb[11].mxu1  ;;  %v1521_v14 = vadd.f32 %v1813_v7, %v1425_v12 }
 0x543   : > { %v1516_v10 = vadd.f32 %v1515_v9, %v1420_v8 }
 0x545   : > { %v1816_v11 = vpop.f32.mrb[12].mxu1  ;;  %1534 = vxpose.xlu0.b32.start [1/4] (short) (narrow) %v1516_v10, 8 }
 0x546   : > { %v1525_v13 = vpop.f32.mrb[13].mxu1  ;;  %v1531_v18 = vadd.f32 %v1816_v11, %v1435_v17 }
 0x547   : > { %v1526_v16 = vadd.f32 %v1525_v13, %v1430_v15 }
 0x549   : > { %1535 = vxpose.xlu0.b32.cont [2/4] (short) (narrow) %v1521_v14, 8 }
 0x54d   : > { %1536 = vxpose.xlu0.b32.cont [3/4] (short) (narrow) %v1526_v16, 8 }
 0x551   : > { %1537 = vxpose.xlu0.b32.end [4/4] (short) (narrow) %v1531_v18, 8 }
 0x5c5   : > { %v1550_v19 = vpop.trf.xlu0 }
 0x5c6   : > { %1566 = vst.msk [vmem:[%s311_s18] sm:$0xff] %vm354_vm0, %v1550_v19 }
 0x5c7   : > { %1910 = shalt.err (!%p1907_p3)
}
 0x5c8   : > { %s1911_s25 = scalar_lea.hbm %s2232_s23, 128  ;;  %s1915_s12 = scalar_lea.hbm %s2283_s8, 256 }
 0x5c9   : > { %p1912_p4 = scmp.ne.s32.totalorder %s2232_s23, %s1911_s25  ;;  %p1916_p9 = scmp.lt.u32.totalorder %s2232_s23, %s2283_s8 }
 0x5ca   : > { %p1917_p10 = scmp.lt.u32.totalorder %s1915_s12, %s1911_s25  ;;  %p1919_p12 = scmp.lt.u32.totalorder %s1911_s25, %s2232_s23 }
 0x5cb   : > { %p1913_p7 = pnand %p1912_p4, %p2048_p5 }
 0x5cc   : > { %p1918_p11 = por %p1917_p10, %p1916_p9 }
 0x5cd   : > { %p1914_p8 = pneg %p1913_p7 }
 0x5ce   : > { %p1920_p13 = por %p1919_p12, %p1918_p11 }
 0x5d0   : > { %p1921_p0 = pnand %p1920_p13, %p1914_p8 }
 0x5d2   : > { %1924 = shalt.err (!%p1921_p0)
}
 0x5d3   : > { %1837 = dma.vmem_to_hbm [thread:$0]  (%p2048_p5), %s2234_s19, 128, %s2232_s23, %s1568_s21  }
 0x5d4 PF: > { %p1843_p1 = scmp.ge.s32.totalorder %s1959_s30, 2  ;;  %s1593_s18 = sand.u32 1, %s1947_s27  }
 0x5d5   : > { %s1594_s20 = scalar_lea.sflag [#allocation3], %s1593_s18 }
 0x5d6   : > { %p1840_p2 = pnand %p1843_p1, %p2052_p6 }
 0x5d8   : > { %1942 = dma.done.wait (!%p1840_p2), %s1594_s20, 128  }
 0x5d9   : > { %1944 = vsyncadd (!%p1840_p2), %s1594_s20, 4294967168  ;;  %s2289_s22 = sld [smem:[#allocation5_spill]]  ;;  %s2290_s29 = sld [smem:[#allocation6_spill]] }
 0x5da   : > { %p18_p3 = scmp.ge.s32.totalorder %s2035_s11, 4   ;;  %s2291_s27 = smov %s1951_s28 }
 0x5db   : > { %s2293_s30 = smov %s2035_s11 }
 0x5dc   :  { %20 = sbr.rel (!%p18_p3) target bundleno = 3 (0x3), region = 90 }
 0x5df   : > { %s2292_s28 = smov %s2289_s22 }
 0x5e3   :  { %1599 = vsyncpa [#allocation3], 1 }
 0x5e4   :  { %1601 = vsyncpa [#allocation3 + $0x1], 1 }

</bundles_post_ra>
